<compile_context>
chip_gen: v7x
topology: tpu7x:2x2x1
jax: 0.10.0
libtpu: 0.0.40
codegen_flags: <defaults>
</compile_context>

<pallas_src>
import functools

import jax
import jax.numpy as jnp
import numpy as np
from jax.experimental import pallas as pl
from jax.experimental.pallas import tpu as pltpu


def _round_up(n, m):
    return ((n + m - 1) // m) * m


def _vmem_bytes(TB, TD, KP):
    """Rough per-step VMEM estimate (double-buffered streams + outputs + scratch), f32."""
    f = 4
    return (3 * 2 * TB * TD * f        # tanh_x, x, w input streams
            + 2 * TB * KP * f          # labels
            + 2 * TD * KP * f          # W' slices
            + 2 * 8 * 128 * f          # b'
            + 2 * TB * TD * f          # corrupt output
            + 2 * TB * KP * f          # logits output
            + 2 * TB * 128 * f         # stats output
            + TB * KP * f + TB * 128 * f)   # accumulator scratch


def prepare_carlini(w_cls, b_cls, mean, std, x_shape, *, block_b=128, block_d=2048):
    """One-time (per attack instance) setup: fold normalization into the classifier, pad the
    class dim to 128 lanes and the feature dim to a TD multiple, and pick tile sizes.

    The CW attack calls forward/backward thousands of times with constant w_cls/mean/std, so
    this must NOT be redone per call.
    """
    B, C, H, W = x_shape
    D = C * H * W
    K = w_cls.shape[1]
    KP = max(128, _round_up(K, 128))

    # --- Fold (im - mean) / std into the classifier (exact, done once). ---------------
    if mean is None:
        w_fold = w_cls.astype(jnp.float32)
        b_fold = b_cls.astype(jnp.float32)
    else:
        mean_flat = jnp.broadcast_to(mean, x_shape)[0].reshape(D).astype(jnp.float32)
        std_flat = jnp.broadcast_to(std, x_shape)[0].reshape(D).astype(jnp.float32)
        inv_std = 1.0 / std_flat
        w_fold = w_cls.astype(jnp.float32) * inv_std[:, None]
        b_fold = b_cls.astype(jnp.float32) - jnp.dot(
            (mean_flat * inv_std)[None, :], w_cls.astype(jnp.float32),
            precision=jax.lax.Precision.HIGHEST)      # one-time fold, keep it accurate

    # --- Tile selection (batch tile TB, feature tile TD), VMEM-budgeted. ----------------
    TB = max(8, (min(block_b, _round_up(B, 8)) // 8) * 8)
    B_pad = _round_up(B, TB)
    # If the whole batch fits in one tile, split it so the "parallel" batch axis has >= 2
    # steps and both v7x TensorCores get work.
    while B_pad // TB < 2 and TB > 8:
        TB = max(8, _round_up(TB // 2, 8))
        B_pad = _round_up(B, TB)

    TD = min(_round_up(D, 128), max(128, _round_up(block_d, 128)))
    budget = 24 * 1024 * 1024   # fits v7x scoped default (32 MiB) with headroom
    while _vmem_bytes(TB, TD, KP) > budget and TD > 128:
        TD = max(128, _round_up(TD // 2, 128))
    while _vmem_bytes(TB, TD, KP) > budget and TB > 8:
        TB = max(8, _round_up(TB // 2, 8))
    D_pad = _round_up(D, TD)

    # --- Pad folded classifier: zero D-rows (no logit contribution), -1e9 on padded class
    #     lanes (can never win the second_logit max). ------------------------------------
    w_fold = jnp.pad(w_fold, ((0, D_pad - D), (0, KP - K)))
    b_fold = jnp.pad(b_fold, ((0, 0), (0, KP - K)), constant_values=-1e9)

    return dict(w_fold=w_fold, b_fold=b_fold,
                B=B, D=D, K=K, KP=KP, TB=TB, TD=TD, B_pad=B_pad, D_pad=D_pad)


def _carlini_forward_kernel(tanh_x_ref, x_ref, w_ref, labels_ref, wcls_ref, bcls_ref,
                            corrupt_ref, logits_ref, stats_ref,
                            acc_logits_ref, acc_dist_ref, *, k, targeted):
    d = pl.program_id(1)

    @pl.when(d == 0)
    def _():
        acc_logits_ref[...] = jnp.zeros_like(acc_logits_ref)
        acc_dist_ref[...] = jnp.zeros_like(acc_dist_ref)

    wt = w_ref[...] + tanh_x_ref[...]
    corrupt = 0.5 * (jnp.tanh(wt) + 1.0)                      # corrupt_im slice in [0,1]
    corrupt_ref[...] = corrupt.astype(corrupt_ref.dtype)

    # Partial logits for this D slice: single-pass (DEFAULT precision) MXU matmul,
    # accumulated in f32 VMEM scratch.
    acc_logits_ref[...] += jnp.dot(corrupt, wcls_ref[...],
                                   preferred_element_type=jnp.float32)

    diff = corrupt - x_ref[...]
    acc_dist_ref[...] += jnp.sum(diff * diff, axis=1, keepdims=True)

    @pl.when(d == pl.num_programs(1) - 1)
    def _():
        logits = acc_logits_ref[...] + bcls_ref[...]          # bias add in f32
        logits_ref[...] = logits

        labels = labels_ref[...]                              # one-hot, 0 on padded lanes
        target_logit = jnp.sum(logits * labels, axis=1, keepdims=True)          # (TB, 1)
        second_logit = jnp.max(logits * (1.0 - labels) - labels * 10000.0,
                               axis=1, keepdims=True)                            # (TB, 1)
        if targeted:
            closs = jnp.maximum(second_logit - target_logit, k)
        else:
            closs = jnp.maximum(target_logit - second_logit, k)

        dist = acc_dist_ref[...]
        # Pack the two per-example scalars into one lane-dense (TB, 128) output block:
        # lane 0 = dist_loss, lane 1 = class_loss, rest zero.
        lane = jax.lax.broadcasted_iota(jnp.int32, stats_ref.shape, 1)
        stats_ref[...] = jnp.where(lane == 0, dist, jnp.where(lane == 1, closs, 0.0))


def carlini_l2_forward(tanh_x, x, w, c, labels, prepared, *, k=0.0, targeted=False):
    """JAX/Pallas equivalent of CarliniL2Generator.forward.

    tanh_x, x, w : (B, C, H, W) float32 (NCHW, same as torch)
    c            : (B, 1) float32
    labels       : (B, K) float32 one-hot
    prepared     : output of prepare_carlini() (folded/padded classifier + tile config)
    Returns (obj, dist_loss, corrupt_im, logits) matching the torch return tuple.
    """
    B, C, H, W = x.shape
    D = C * H * W
    assert B == prepared["B"] and D == prepared["D"]
    K, KP = prepared["K"], prepared["KP"]
    TB, TD = prepared["TB"], prepared["TD"]
    B_pad, D_pad = prepared["B_pad"], prepared["D_pad"]
    nb, nd = B_pad // TB, D_pad // TD

    def pad2(a, const):
        return jnp.pad(a.reshape(B, D), ((0, B_pad - B), (0, D_pad - D)),
                       constant_values=const)

    # Padded tanh_x columns = -30 -> tanh saturates to -1 exactly -> corrupt == 0 there,
    # so padded columns contribute 0 to both dist and logits.
    tanh_x_p = pad2(tanh_x.astype(jnp.float32), -30.0)
    x_p = pad2(x.astype(jnp.float32), 0.0)
    w_p = pad2(w.astype(jnp.float32), 0.0)
    labels_p = jnp.pad(labels.astype(jnp.float32), ((0, B_pad - B), (0, KP - K)))

    kern = functools.partial(_carlini_forward_kernel, k=float(k), targeted=bool(targeted))

    grid_spec = pltpu.PrefetchScalarGridSpec(
        num_scalar_prefetch=0,
        grid=(nb, nd),
        in_specs=[
            pl.BlockSpec((TB, TD), lambda i, d: (i, d)),   # tanh_x
            pl.BlockSpec((TB, TD), lambda i, d: (i, d)),   # x
            pl.BlockSpec((TB, TD), lambda i, d: (i, d)),   # w
            pl.BlockSpec((TB, KP), lambda i, d: (i, 0)),   # labels (per batch tile)
            pl.BlockSpec((TD, KP), lambda i, d: (d, 0)),   # W' slices (stream over D)
            pl.BlockSpec((1, KP), lambda i, d: (0, 0)),    # b' (grid-resident, tiny)
        ],
        out_specs=[
            pl.BlockSpec((TB, TD), lambda i, d: (i, d)),   # corrupt_im (flat)
            pl.BlockSpec((TB, KP), lambda i, d: (i, 0)),   # logits (resident over D)
            pl.BlockSpec((TB, 128), lambda i, d: (i, 0)),  # packed [dist, closs, 0...]
        ],
        scratch_shapes=[
            pltpu.VMEM((TB, KP), jnp.float32),             # logits accumulator
            pltpu.VMEM((TB, 1), jnp.float32),              # dist accumulator
        ],
    )

    out_shapes = (
        jax.ShapeDtypeStruct((B_pad, D_pad), jnp.float32),
        jax.ShapeDtypeStruct((B_pad, KP), jnp.float32),
        jax.ShapeDtypeStruct((B_pad, 128), jnp.float32),
    )

    cost = pl.CostEstimate(
        flops=int(2 * B_pad * D_pad * KP + 10 * B_pad * D_pad),
        transcendentals=int(B_pad * D_pad),
        bytes_accessed=int(4 * (4 * B_pad * D_pad + D_pad * KP
                                + 2 * B_pad * KP + 2 * B_pad * 128)),
    )

    corrupt_flat, logits_pad, stats = pl.pallas_call(
        kern,
        grid_spec=grid_spec,
        out_shape=out_shapes,
        cost_estimate=cost,
        compiler_params=pltpu.CompilerParams(
            dimension_semantics=("parallel", "arbitrary"),
            vmem_limit_bytes=32 * 1024 * 1024),
    )(tanh_x_p, x_p, w_p, labels_p, prepared["w_fold"], prepared["b_fold"])

    dist_loss = stats[:B, 0]      # (B,)
    class_loss = stats[:B, 1]     # (B,)
    logits = logits_pad[:B, :K]
    corrupt_im = corrupt_flat[:B, :D].reshape(B, C, H, W)

    # Exact torch broadcasting quirk: c is (B,1), class_loss is (B,) -> (B,B); + dist_loss
    # -> (B,B); then a full sum. Tiny glue kept in JAX on purpose.
    obj = jnp.sum(dist_loss + c * class_loss)
    return obj, dist_loss, corrupt_im, logits


def _reference_forward(tanh_x, x, w, c, labels, mean, std, w_cls, b_cls,
                       *, k=0.0, targeted=False):
    """Pure-JAX reference (mirrors the torch forward verbatim)."""
    B = x.shape[0]
    corrupt = 0.5 * (jnp.tanh(w + tanh_x) + 1.0)
    inp = corrupt if mean is None else (corrupt - mean) / std
    logits = jnp.dot(inp.reshape(B, -1), w_cls,
                     precision=jax.lax.Precision.HIGHEST) + b_cls
    target_logit = jnp.sum(logits * labels, axis=1)
    second_logit = jnp.max(logits * (1.0 - labels) - labels * 10000.0, axis=1)
    if targeted:
        closs = jnp.maximum(second_logit - target_logit, k)
    else:
        closs = jnp.maximum(target_logit - second_logit, k)
    dist = jnp.sum((corrupt - x).reshape(B, -1) ** 2, axis=1)
    obj = jnp.sum(dist + c * closs)
    return obj, dist, corrupt, logits


# TODO(synk): the outer generate() loop (Adam/SGD steps + binary search over c + best-image
# bookkeeping) is host-side control flow driving repeated forward/backward calls; only the
# forward objective is kernelized (the "model" is represented by an affine classifier).

if __name__ == "__main__":
    # Small shapes consistent with the module: batch=2, channels=4, spatial=16x16, 10 classes.
    B, C, H, W = 2, 4, 16, 16
    D = C * H * W
    K = 10

    key = jax.random.PRNGKey(0)
    k_x, k_w, k_lbl, k_wc, k_bc = jax.random.split(key, 5)

    # x: images in [0,1]^d (unnormalized), as the torch code expects.
    x = jax.random.uniform(k_x, (B, C, H, W), dtype=jnp.float32, minval=0.0, maxval=1.0)
    # tanh-space images, as built in generate(): arctanh(1.999999 * (x - 0.5))
    tanh_x = jnp.arctanh(1.999999 * (x - 0.5)).astype(jnp.float32)
    # perturbation variable w (optimized in generate()); small random here.
    w_pert = 0.05 * jax.random.normal(k_w, (B, C, H, W), dtype=jnp.float32)
    # per-example optimization constants c, shape (B,1) like opt_consts.
    c = jnp.full((B, 1), 0.1, dtype=jnp.float32)
    # one-hot labels (B, K)
    lbl_idx = jax.random.randint(k_lbl, (B,), 0, K)
    labels = jax.nn.one_hot(lbl_idx, K, dtype=jnp.float32)
    # per-channel normalization (expanded to image shape, as generate() does).
    mean_c = jnp.array([0.485, 0.456, 0.406, 0.5], dtype=jnp.float32)
    std_c = jnp.array([0.229, 0.224, 0.225, 0.25], dtype=jnp.float32)
    mean = jnp.broadcast_to(mean_c[None, :, None, None], (B, C, H, W))
    std = jnp.broadcast_to(std_c[None, :, None, None], (B, C, H, W))
    # Deterministic synthetic classifier weights (the "model").
    w_cls = (jax.random.normal(k_wc, (D, K), dtype=jnp.float32) / np.sqrt(D)).astype(jnp.float32)
    b_cls = 0.01 * jax.random.normal(k_bc, (1, K), dtype=jnp.float32)

    # One-time setup (hoisted out of the per-call forward).  block_d=512 so D=1024 exercises
    # the 2-step D-reduction path of the kernel.
    prepared = prepare_carlini(w_cls, b_cls, mean, std, (B, C, H, W),
                               block_b=128, block_d=512)

    # confidence = 0.0 -> k = -confidence = 0.0 ; untargeted (args.target == 'none')
    obj, dist_loss, corrupt_im, logits = carlini_l2_forward(
        tanh_x, x, w_pert, c, labels, prepared, k=0.0, targeted=False)
    jax.block_until_ready((obj, dist_loss, corrupt_im, logits))

    # Sanity check against a pure-JAX reference (tolerances accept the folded-vs-divided
    # normalization and the DEFAULT-precision MXU pass).
    obj_r, dist_r, corrupt_r, logits_r = _reference_forward(
        tanh_x, x, w_pert, c, labels, mean, std, w_cls, b_cls, k=0.0, targeted=False)
    np.testing.assert_allclose(np.asarray(corrupt_im), np.asarray(corrupt_r), rtol=1e-2, atol=1e-2)
    np.testing.assert_allclose(np.asarray(logits), np.asarray(logits_r), rtol=1e-2, atol=1e-2)
    np.testing.assert_allclose(np.asarray(dist_loss), np.asarray(dist_r), rtol=1e-2, atol=1e-2)
    np.testing.assert_allclose(np.asarray(obj), np.asarray(obj_r), rtol=1e-2, atol=1e-2)

    assert corrupt_im.shape == (B, C, H, W)
    assert logits.shape == (B, K)
    assert dist_loss.shape == (B,)
    print("KERNEL_OK")
</pallas_src>

<mosaic_0001>
module attributes {stable_mosaic.version = 11 : i64} {
  func.func @_carlini_forward_kernel(%arg0: i32, %arg1: i32, %arg2: memref<8x512xf32, #tpu.memory_space<vmem>>, %arg3: memref<8x512xf32, #tpu.memory_space<vmem>>, %arg4: memref<8x512xf32, #tpu.memory_space<vmem>>, %arg5: memref<8x128xf32, #tpu.memory_space<vmem>>, %arg6: memref<512x128xf32, #tpu.memory_space<vmem>>, %arg7: memref<1x128xf32, #tpu.memory_space<vmem>>, %arg8: memref<8x512xf32, #tpu.memory_space<vmem>>, %arg9: memref<8x128xf32, #tpu.memory_space<vmem>>, %arg10: memref<8x128xf32, #tpu.memory_space<vmem>>, %arg11: memref<8x128xf32, #tpu.memory_space<vmem>>, %arg12: memref<8x1xf32, #tpu.memory_space<vmem>>) attributes {dimension_semantics = [#tpu.dimension_semantics<parallel>, #tpu.dimension_semantics<arbitrary>], iteration_bounds = array<i64: 1, 2>, scalar_prefetch = 0 : i64, scratch_operands = 2 : i64, tpu.core_type = #tpu.core_type<tc>, window_params = [{transform_indices = @transform_0, window_bounds = array<i64: 8, 512>}, {transform_indices = @transform_1, window_bounds = array<i64: 8, 512>}, {transform_indices = @transform_2, window_bounds = array<i64: 8, 512>}, {transform_indices = @transform_3, window_bounds = array<i64: 8, 128>}, {transform_indices = @transform_4, window_bounds = array<i64: 512, 128>}, {pipeline_mode = #tpu.pipeline_mode<synchronous>, transform_indices = @transform_5, window_bounds = array<i64: 1, 128>}, {transform_indices = @transform_6, window_bounds = array<i64: 8, 512>}, {transform_indices = @transform_7, window_bounds = array<i64: 8, 128>}, {transform_indices = @transform_8, window_bounds = array<i64: 8, 128>}]} {
    %c0_i32 = arith.constant 0 : i32
    %0 = arith.cmpi eq, %arg1, %c0_i32 : i32
    %1 = arith.extui %0 : i1 to i32
    %c0_i32_0 = arith.constant 0 : i32
    %2 = arith.cmpi ne, %1, %c0_i32_0 : i32
    scf.if %2 {
      %cst_22 = arith.constant 0.000000e+00 : f32
      %28 = vector.broadcast %cst_22 : f32 to vector<8x128xf32>
      %c0_23 = arith.constant 0 : index
      %c0_24 = arith.constant 0 : index
      %29 = vector.load %arg11[%c0_23, %c0_24] : memref<8x128xf32, #tpu.memory_space<vmem>>, vector<8x128xf32>
      tpu.vector_store %arg11[%c0_23, %c0_24], %28 {strides = array<i32>} : memref<8x128xf32, #tpu.memory_space<vmem>>, vector<8x128xf32>,
      %cst_25 = arith.constant 0.000000e+00 : f32
      %30 = vector.broadcast %cst_25 : f32 to vector<8x1xf32>
      %c0_26 = arith.constant 0 : index
      %c0_27 = arith.constant 0 : index
      %31 = vector.load %arg12[%c0_26, %c0_27] : memref<8x1xf32, #tpu.memory_space<vmem>>, vector<8x1xf32>
      tpu.vector_store %arg12[%c0_26, %c0_27], %30 {strides = array<i32>} : memref<8x1xf32, #tpu.memory_space<vmem>>, vector<8x1xf32>,
    } else {
    }
    %c0 = arith.constant 0 : index
    %c0_1 = arith.constant 0 : index
    %3 = vector.load %arg4[%c0, %c0_1] : memref<8x512xf32, #tpu.memory_space<vmem>>, vector<8x512xf32>
    %c0_2 = arith.constant 0 : index
    %c0_3 = arith.constant 0 : index
    %4 = vector.load %arg2[%c0_2, %c0_3] : memref<8x512xf32, #tpu.memory_space<vmem>>, vector<8x512xf32>
    %5 = arith.addf %3, %4 : vector<8x512xf32>
    %6 = math.tanh %5 : vector<8x512xf32>
    %cst = arith.constant 1.000000e+00 : f32
    %7 = vector.broadcast %cst : f32 to vector<8x512xf32>
    %8 = arith.addf %6, %7 : vector<8x512xf32>
    %cst_4 = arith.constant 5.000000e-01 : f32
    %9 = vector.broadcast %cst_4 : f32 to vector<8x512xf32>
    %10 = arith.mulf %9, %8 : vector<8x512xf32>
    %c0_5 = arith.constant 0 : index
    %c0_6 = arith.constant 0 : index
    %11 = vector.load %arg8[%c0_5, %c0_6] : memref<8x512xf32, #tpu.memory_space<vmem>>, vector<8x512xf32>
    tpu.vector_store %arg8[%c0_5, %c0_6], %10 {strides = array<i32>} : memref<8x512xf32, #tpu.memory_space<vmem>>, vector<8x512xf32>,
    %c0_7 = arith.constant 0 : index
    %c0_8 = arith.constant 0 : index
    %12 = vector.load %arg11[%c0_7, %c0_8] : memref<8x128xf32, #tpu.memory_space<vmem>>, vector<8x128xf32>
    %c0_9 = arith.constant 0 : index
    %c0_10 = arith.constant 0 : index
    %13 = vector.load %arg6[%c0_9, %c0_10] : memref<512x128xf32, #tpu.memory_space<vmem>>, vector<512x128xf32>
    %cst_11 = arith.constant dense<0.000000e+00> : vector<8x128xf32>
    %14 = tpu.matmul %10, %13, %cst_11 {dimension_numbers = #tpu.dot_dimension_numbers<[1], [0], [0], [1], [0, 0, 1, 1], [], []>} : vector<8x512xf32>, vector<512x128xf32>, vector<8x128xf32> -> vector<8x128xf32>
    %15 = arith.addf %12, %14 : vector<8x128xf32>
    %c0_12 = arith.constant 0 : index
    %c0_13 = arith.constant 0 : index
    %16 = vector.load %arg11[%c0_12, %c0_13] : memref<8x128xf32, #tpu.memory_space<vmem>>, vector<8x128xf32>
    tpu.vector_store %arg11[%c0_12, %c0_13], %15 {strides = array<i32>} : memref<8x128xf32, #tpu.memory_space<vmem>>, vector<8x128xf32>,
    %c0_14 = arith.constant 0 : index
    %c0_15 = arith.constant 0 : index
    %17 = vector.load %arg3[%c0_14, %c0_15] : memref<8x512xf32, #tpu.memory_space<vmem>>, vector<8x512xf32>
    %18 = arith.subf %10, %17 : vector<8x512xf32>
    %c0_16 = arith.constant 0 : index
    %c0_17 = arith.constant 0 : index
    %19 = vector.load %arg12[%c0_16, %c0_17] : memref<8x1xf32, #tpu.memory_space<vmem>>, vector<8x1xf32>
    %20 = arith.mulf %18, %18 : vector<8x512xf32>
    %cst_18 = arith.constant dense<0.000000e+00> : vector<8xf32>
    %21 = vector.multi_reduction <add>, %20, %cst_18 [1] : vector<8x512xf32> to vector<8xf32>
    %22 = vector.shape_cast %21 : vector<8xf32> to vector<8x1xf32>
    %23 = arith.addf %19, %22 : vector<8x1xf32>
    %c0_19 = arith.constant 0 : index
    %c0_20 = arith.constant 0 : index
    %24 = vector.load %arg12[%c0_19, %c0_20] : memref<8x1xf32, #tpu.memory_space<vmem>>, vector<8x1xf32>
    tpu.vector_store %arg12[%c0_19, %c0_20], %23 {strides = array<i32>} : memref<8x1xf32, #tpu.memory_space<vmem>>, vector<8x1xf32>,
    %c1_i32 = arith.constant 1 : i32
    %25 = arith.cmpi eq, %arg1, %c1_i32 : i32
    %26 = arith.extui %25 : i1 to i32
    %c0_i32_21 = arith.constant 0 : i32
    %27 = arith.cmpi ne, %26, %c0_i32_21 : i32
    scf.if %27 {
      %c0_22 = arith.constant 0 : index
      %c0_23 = arith.constant 0 : index
      %28 = vector.load %arg11[%c0_22, %c0_23] : memref<8x128xf32, #tpu.memory_space<vmem>>, vector<8x128xf32>
      %c0_24 = arith.constant 0 : index
      %c0_25 = arith.constant 0 : index
      %29 = vector.load %arg7[%c0_24, %c0_25] : memref<1x128xf32, #tpu.memory_space<vmem>>, vector<1x128xf32>
      %30 = vector.broadcast %29 : vector<1x128xf32> to vector<8x128xf32>
      %31 = arith.addf %28, %30 : vector<8x128xf32>
      %c0_26 = arith.constant 0 : index
      %c0_27 = arith.constant 0 : index
      %32 = vector.load %arg9[%c0_26, %c0_27] : memref<8x128xf32, #tpu.memory_space<vmem>>, vector<8x128xf32>
      tpu.vector_store %arg9[%c0_26, %c0_27], %31 {strides = array<i32>} : memref<8x128xf32, #tpu.memory_space<vmem>>, vector<8x128xf32>,
      %c0_28 = arith.constant 0 : index
      %c0_29 = arith.constant 0 : index
      %33 = vector.load %arg5[%c0_28, %c0_29] : memref<8x128xf32, #tpu.memory_space<vmem>>, vector<8x128xf32>
      %34 = arith.mulf %31, %33 : vector<8x128xf32>
      %cst_30 = arith.constant dense<0.000000e+00> : vector<8xf32>
      %35 = vector.multi_reduction <add>, %34, %cst_30 [1] : vector<8x128xf32> to vector<8xf32>
      %36 = vector.shape_cast %35 : vector<8xf32> to vector<8x1xf32>
      %cst_31 = arith.constant 1.000000e+00 : f32
      %37 = vector.broadcast %cst_31 : f32 to vector<8x128xf32>
      %38 = arith.subf %37, %33 : vector<8x128xf32>
      %39 = arith.mulf %31, %38 : vector<8x128xf32>
      %cst_32 = arith.constant 1.000000e+04 : f32
      %40 = vector.broadcast %cst_32 : f32 to vector<8x128xf32>
      %41 = arith.mulf %33, %40 : vector<8x128xf32>
      %42 = arith.subf %39, %41 : vector<8x128xf32>
      %cst_33 = arith.constant dense<0xFF800000> : vector<8xf32>
      %43 = vector.multi_reduction <maximumf>, %42, %cst_33 [1] : vector<8x128xf32> to vector<8xf32>
      %44 = vector.shape_cast %43 : vector<8xf32> to vector<8x1xf32>
      %45 = arith.subf %36, %44 : vector<8x1xf32>
      %cst_34 = arith.constant 0.000000e+00 : f32
      %46 = vector.broadcast %cst_34 : f32 to vector<8x1xf32>
      %47 = arith.maximumf %45, %46 : vector<8x1xf32>
      %c0_35 = arith.constant 0 : index
      %c0_36 = arith.constant 0 : index
      %48 = vector.load %arg12[%c0_35, %c0_36] : memref<8x1xf32, #tpu.memory_space<vmem>>, vector<8x1xf32>
      %49 = tpu.iota {dimensions = array<i32: 1>} : vector<8x128xi32>
      %c0_i32_37 = arith.constant 0 : i32
      %50 = vector.broadcast %c0_i32_37 : i32 to vector<8x128xi32>
      %51 = arith.cmpi eq, %49, %50 : vector<8x128xi32>
      %c1_i32_38 = arith.constant 1 : i32
      %52 = vector.broadcast %c1_i32_38 : i32 to vector<8x128xi32>
      %53 = arith.cmpi eq, %49, %52 : vector<8x128xi32>
      %cst_39 = arith.constant 0.000000e+00 : f32
      %54 = vector.shape_cast %47 : vector<8x1xf32> to vector<8x1xf32>
      %55 = vector.broadcast %54 : vector<8x1xf32> to vector<8x128xf32>
      %56 = vector.broadcast %cst_39 : f32 to vector<8x128xf32>
      %57 = arith.select %53, %55, %56 : vector<8x128xi1>, vector<8x128xf32>
      %58 = vector.shape_cast %48 : vector<8x1xf32> to vector<8x1xf32>
      %59 = vector.broadcast %58 : vector<8x1xf32> to vector<8x128xf32>
      %60 = arith.select %51, %59, %57 : vector<8x128xi1>, vector<8x128xf32>
      %c0_40 = arith.constant 0 : index
      %c0_41 = arith.constant 0 : index
      %61 = vector.load %arg10[%c0_40, %c0_41] : memref<8x128xf32, #tpu.memory_space<vmem>>, vector<8x128xf32>
      tpu.vector_store %arg10[%c0_40, %c0_41], %60 {strides = array<i32>} : memref<8x128xf32, #tpu.memory_space<vmem>>, vector<8x128xf32>,
    } else {
    }
    return
  }
  func.func @transform_0(%arg0: i32, %arg1: i32) -> (i32, i32) {
    %c0_i32 = arith.constant 0 : i32
    return %arg0, %arg1 : i32, i32
  }
  func.func @transform_1(%arg0: i32, %arg1: i32) -> (i32, i32) {
    %c0_i32 = arith.constant 0 : i32
    return %arg0, %arg1 : i32, i32
  }
  func.func @transform_2(%arg0: i32, %arg1: i32) -> (i32, i32) {
    %c0_i32 = arith.constant 0 : i32
    return %arg0, %arg1 : i32, i32
  }
  func.func @transform_3(%arg0: i32, %arg1: i32) -> (i32, i32) {
    %c0_i32 = arith.constant 0 : i32
    %c0_i32_0 = arith.constant 0 : i32
    return %arg0, %c0_i32 : i32, i32
  }
  func.func @transform_4(%arg0: i32, %arg1: i32) -> (i32, i32) {
    %c0_i32 = arith.constant 0 : i32
    %c0_i32_0 = arith.constant 0 : i32
    return %arg1, %c0_i32 : i32, i32
  }
  func.func @transform_5(%arg0: i32, %arg1: i32) -> (i32, i32) {
    %c0_i32 = arith.constant 0 : i32
    %c0_i32_0 = arith.constant 0 : i32
    %c0_i32_1 = arith.constant 0 : i32
    return %c0_i32, %c0_i32_0 : i32, i32
  }
  func.func @transform_6(%arg0: i32, %arg1: i32) -> (i32, i32) {
    %c0_i32 = arith.constant 0 : i32
    return %arg0, %arg1 : i32, i32
  }
  func.func @transform_7(%arg0: i32, %arg1: i32) -> (i32, i32) {
    %c0_i32 = arith.constant 0 : i32
    %c0_i32_0 = arith.constant 0 : i32
    return %arg0, %c0_i32 : i32, i32
  }
  func.func @transform_8(%arg0: i32, %arg1: i32) -> (i32, i32) {
    %c0_i32 = arith.constant 0 : i32
    %c0_i32_0 = arith.constant 0 : i32
    return %arg0, %c0_i32 : i32, i32
  }
}

</mosaic_0001>

<bundles_post_ra>
// kernel: tpu_custom_call.1
= control target key start
LH: loop header
LB: loop body
LE: loop exit
PB: predicated region body
PF: predicated region fallthrough
CT: control target
= control target key end

     0   :  { %s2067_s0 = inlined_call_operand.hbm [shape: f32[8,1024], index: 0, kind: input, shape index: {}]   ;;  %s2068_s1 = inlined_call_operand.hbm [shape: f32[8,1024], index: 1, kind: input, shape index: {}]   ;;  %s2069_s2 = inlined_call_operand.hbm [shape: f32[8,1024], index: 2, kind: input, shape index: {}]   ;;  %s2070_s3 = inlined_call_operand.vmem [shape: f32[8,128], index: 3, kind: input, shape index: {}]   ;;  %s2071_s4 = inlined_call_operand.hbm [shape: f32[1024,128], index: 4, kind: input, shape index: {}]   ;;  %s2072_s5 = inlined_call_operand.vmem [shape: f32[1,128], index: 5, kind: input, shape index: {}]   ;;  %s2073_s6 = inlined_call_operand.hbm [shape: f32[8,1024], index: 6, kind: output, shape index: {0}]   ;;  %s2074_s7 = inlined_call_operand.hbm [shape: f32[8,128], index: 7, kind: output, shape index: {1}]   ;;  %s2075_s8 = inlined_call_operand.hbm [shape: f32[8,128], index: 8, kind: output, shape index: {2}]  }
   0x1   :  { %2091 = sst [smem:[#allocation28_spill]] %s2068_s1 }
   0x2   :  { %2092 = sst [smem:[#allocation29_spill]] %s2073_s6 }
   0x3   :  { %2093 = sst [smem:[#allocation30_spill]] %s2075_s8 }
   0x4   :  { %14 = vsyncpa [#allocation5], 0 }
   0x5   :  { %16 = vsyncpa [#allocation5 + $0x1], 0 }
   0x6   :  { %17 = vsyncpa [#allocation8], 0 }
   0x7   :  { %19 = vsyncpa [#allocation8 + $0x1], 0 }
   0x8   :  { %20 = vsyncpa [#allocation11], 0 }
   0x9   :  { %22 = vsyncpa [#allocation11 + $0x1], 0 }
   0xa   :  { %23 = vsyncpa [#allocation6], 0 }
   0xb   :  { %25 = vsyncpa [#allocation6 + $0x1], 0 }
   0xc   :  { %26 = vsyncpa [#allocation14], 0  ;;  %s1633_s27 = smov 0   ;;  %s1635_s28 = smov 0  }
   0xd   :  { %s1637_s29 = smov 0   ;;  %s1639_s30 = smov 0  }
   0xe   :  { %s1641_s9 = smov 0   ;;  %s1643_s10 = smov 0  }
   0xf LB: > { %2094 = sst [smem:[#allocation21_spill]] %s1555_s27  ;;  %s1664_s11 = sadd.s32 4294967295, %s1575_s10   ;;  %s1575_s10 = sphi %s1643_s10, %s32_s10   ;;  %s1571_s9 = sphi %s1641_s9, %s2136_s9   ;;  %s1567_s30 = sphi %s1639_s30, %s2135_s30   ;;  %s1563_s29 = sphi %s1637_s29, %s2131_s29   ;;  %s1559_s28 = sphi %s1635_s28, %s2134_s28   ;;  %s1555_s27 = sphi %s1633_s27, %s2133_s27  }
  0x10   : > { %2095 = sst [smem:[#allocation22_spill]] %s1563_s29  ;;  %s1031_s12 = sadd.s32 4294967294, %s1575_s10  }
  0x11   : > { %2096 = sst [smem:[#allocation23_spill]] %s1575_s10  ;;  %s41_s13 = sadd.s32 1, %s1571_s9 }
  0x12   : > { %s53_s14 = sadd.s32 1, %s1563_s29  ;;  %p42_p0 = scmp.ge.s32.totalorder %s41_s13, 2 }
  0x13   : > { %p60_p1 = scmp.ne.s32.totalorder %s1563_s29, %s1559_s28  ;;  %p61_p2 = scmp.eq.s32.totalorder %s1575_s10, 0 }
  0x14   : > { %p66_p3 = scmp.ne.s32.totalorder %s1559_s28, %s1555_s27  ;;  %s2138_s13 = smov (%p42_p0, %s41_s13), 0 }
  0x15   : > { %2097 = sst [smem:[#allocation24_spill]] %s2138_s13  ;;  %p1676_p4 = por %p61_p2, %p60_p1 }
  0x16   : > { %p67_p5 = scmp.eq.s32.totalorder %s1664_s11, 0  ;;  %s49_s16 = ssub.s32 %s1571_s9, %s2138_s13 }
  0x17   : > { %p2080_p6 = scmp.eq.s32.totalorder %s1664_s11, 1  ;;  %p51_p7 = scmp.eq.s32.totalorder %s49_s16, 0 }
  0x18   : > { %p1684_p8 = por %p67_p5, %p66_p3  ;;  %p227_p10 = scmp.eq.s32.totalorder %s1031_s12, 1 }
  0x19   : > { %p1690_p9 = por %p2080_p6, %p60_p1  ;;  %p1239_p13 = scmp.lt.s32.totalorder %s1575_s10, 2 }
  0x1a   : > { %s2099_s17 = scalar_select %p1684_p8, 1, 0 }
  0x1b   : > { %s2100_s18 = scalar_select %p1690_p9, 1, 0 }
  0x1c   : > { %s1695_s19 = scalar_select %p51_p7, %s1563_s29, %s53_s14  }
  0x1d   : > { %2101 = sst [smem:[#allocation25_spill]] %s2100_s18  ;;  %p1697_p11 = por %p227_p10, %p66_p3 }
  0x1e   : > { %2102 = sst [smem:[#allocation26_spill]] %s1695_s19  ;;  %s1704_s21 = sand.u32 1, %s1563_s29  }
  0x1f   : > { %s2103_s20 = scalar_select %p1697_p11, 1, 0 }
  0x20   : > { %s1707_s22 = sshll.u32 %s1704_s21, 5  ;;  %s1710_s23 = sshll.u32 %s1571_s9, 9 }
  0x21   : > { %2104 = sst [smem:[#allocation27_spill]] %s2103_s20  ;;  %p1714_p0 = pnand %p1239_p13, %p1676_p4 }
  0x22   : > { %s330_s25 = sand.u32 1, %s1575_s10   ;;  %s2106_s1 = sld [smem:[#allocation28_spill]] }
  0x23   : > { %s2105_s24 = scalar_select %p1714_p0, 1, 0 }
  0x24   : > { %s334_s16 = scalar_lea.vmem [#allocation7], %s1707_s22  ;;  %s1730_s15 = scalar_lea.sflag [#allocation8], %s330_s25 }
  0x25   : > { %s344_s13 = sshll.u32 %s334_s16, 4  ;;  %p1736_p4 = pneg %p1714_p0  ;;  %s1727_s13 = int_to_ptr.vmem [resolvable:$true] %s344_s13 }
  0x28   : > { %s1723_s14 = scalar_lea.hbm %s2106_s1, %s1710_s23  ;;  %s1314_s16 = scalar_lea.hbm %s2106_s1, 1024 }
  0x29   : > { %s1309_s19 = scalar_lea.hbm %s1723_s14, 512  ;;  %p1315_p10 = scmp.lt.u32.totalorder %s1723_s14, %s2106_s1 }
  0x2a   : > { %p1310_p3 = scmp.ne.s32.totalorder %s1723_s14, %s1309_s19  ;;  %p1316_p13 = scmp.lt.u32.totalorder %s1314_s16, %s1309_s19 }
  0x2b   : > { %p1318_p6 = scmp.lt.u32.totalorder %s1309_s19, %s1723_s14 }
  0x2c   : > { %p1312_p5 = pnand %p1736_p4, %p1310_p3  ;;  %p1317_p12 = por %p1316_p13, %p1315_p10 }
  0x2e   : > { %p1313_p7 = pneg %p1312_p5  ;;  %p1319_p1 = por %p1318_p6, %p1317_p12 }
  0x30   : > { %p1320_p2 = pnand %p1319_p1, %p1313_p7 }
  0x32   : > { %1323 = shalt.err (!%p1320_p2)
}
  0x33   : > { %s1324_s25 = scalar_lea.vmem %s1727_s13, 512  ;;  %s1577_s26 = smov [#allocation7]  }
  0x34   : > { %p1325_p3 = scmp.ne.s32.totalorder %s1727_s13, %s1324_s25  ;;  %s1329_s12 = sshll.u32 %s1577_s26, 4  ;;  %s1330_s12 = int_to_ptr.vmem [resolvable:$false] %s1329_s12 }
  0x35   : > { %s1331_s27 = scalar_lea.vmem %s1330_s12, 1024  ;;  %p1332_p9 = scmp.lt.s32.totalorder %s1727_s13, %s1330_s12 }
  0x36   : > { %p1327_p5 = pnand %p1325_p3, %p1736_p4  ;;  %p1333_p8 = scmp.lt.s32.totalorder %s1331_s27, %s1324_s25 }
  0x38   : > { %p1328_p11 = pneg %p1327_p5  ;;  %p1334_p10 = por %p1333_p8, %p1332_p9 }
  0x3a   : > { %p1335_p13 = pnand %p1334_p10, %p1328_p11 }
  0x3c   : > { %1338 = shalt.err (!%p1335_p13)
}
  0x3d   : > { %1228 = dma.hbm_to_vmem [thread:$0]  (!%p1714_p0), %s1723_s14, 512, %s1727_s13, %s1730_s15  }
  0x3e   : > { %p2108_p6 = scmp.lt.s32.totalorder %s1575_s10, 3  ;;  %p2109_p12 = scmp.ge.s32.totalorder %s1575_s10, 1 }
  0x3f   : > { %s1772_s25 = scalar_lea.hbm %s2067_s0, %s1710_s23  ;;  %s313_s26 = scalar_lea.vmem [#allocation4], %s1707_s22 }
  0x40   : > { %p1764_p1 = pnand %p2109_p12, %p2108_p6  ;;  %s323_s12 = sshll.u32 %s313_s26, 4  ;;  %s1775_s12 = int_to_ptr.vmem [resolvable:$true] %s323_s12 }
  0x41   : > { %s1781_s27 = scalar_lea.hbm %s2069_s2, %s1710_s23  ;;  %s310_s1 = scalar_lea.sflag [#allocation5], %s1704_s21 }
  0x42   : > { %s2110_s19 = scalar_select %p1764_p1, 1, 0 }
  0x43   : > { %s1339_s10 = scalar_lea.hbm %s1772_s25, 512  ;;  %s1344_s8 = scalar_lea.hbm %s2067_s0, 1024 }
  0x44   : > { %p1340_p8 = scmp.ne.s32.totalorder %s1772_s25, %s1339_s10  ;;  %p1345_p2 = scmp.lt.u32.totalorder %s1772_s25, %s2067_s0 }
  0x45   : > { %p1346_p7 = scmp.lt.u32.totalorder %s1344_s8, %s1339_s10  ;;  %p1348_p5 = scmp.lt.u32.totalorder %s1339_s10, %s1772_s25 }
  0x46   : > { %p1342_p9 = pnand %p1340_p8, %p1736_p4 }
  0x47   : > { %p1347_p3 = por %p1346_p7, %p1345_p2 }
  0x48   : > { %p1343_p11 = pneg %p1342_p9 }
  0x49   : > { %p1349_p10 = por %p1348_p5, %p1347_p3 }
  0x4b   : > { %p1350_p13 = pnand %p1349_p10, %p1343_p11 }
  0x4d   : > { %1353 = shalt.err (!%p1350_p13)
}
  0x4e   : > { %s1354_s23 = scalar_lea.vmem %s1775_s12, 512  ;;  %s1578_s26 = smov [#allocation4]  }
  0x4f   : > { %p1355_p6 = scmp.ne.s32.totalorder %s1775_s12, %s1354_s23  ;;  %s1359_s13 = sshll.u32 %s1578_s26, 4  ;;  %s1360_s13 = int_to_ptr.vmem [resolvable:$false] %s1359_s13 }
  0x50   : > { %s1361_s6 = scalar_lea.vmem %s1360_s13, 1024  ;;  %p1362_p9 = scmp.lt.s32.totalorder %s1775_s12, %s1360_s13 }
  0x51   : > { %p1357_p12 = pnand %p1355_p6, %p1736_p4  ;;  %p1363_p1 = scmp.lt.s32.totalorder %s1361_s6, %s1354_s23 }
  0x53   : > { %p1358_p8 = pneg %p1357_p12  ;;  %p1364_p2 = por %p1363_p1, %p1362_p9 }
  0x55   : > { %p1365_p7 = pnand %p1364_p2, %p1358_p8 }
  0x57   : > { %1368 = shalt.err (!%p1365_p7)
}
  0x58   : > { %1225 = dma.hbm_to_vmem [thread:$0]  (!%p1714_p0), %s1772_s25, 512, %s1775_s12, %s310_s1  }
  0x59   : > { %s355_s8 = scalar_lea.vmem [#allocation9], %s1707_s22  ;;  %s1044_s18 = sshll.u32 %s1704_s21, 9 }
  0x5a   : > { %s365_s10 = sshll.u32 %s355_s8, 4  ;;  %s1369_s14 = scalar_lea.hbm %s1781_s27, 512  ;;  %s366_s10 = int_to_ptr.vmem [resolvable:$true] %s365_s10 }
  0x5b   : > { %p1370_p1 = scmp.ne.s32.totalorder %s1781_s27, %s1369_s14  ;;  %s1374_s23 = scalar_lea.hbm %s2069_s2, 1024 }
  0x5c   : > { %p1375_p5 = scmp.lt.u32.totalorder %s1781_s27, %s2069_s2  ;;  %p1376_p10 = scmp.lt.u32.totalorder %s1374_s23, %s1369_s14 }
  0x5d   : > { %p1372_p11 = pnand %p1370_p1, %p1736_p4  ;;  %p1378_p6 = scmp.lt.u32.totalorder %s1369_s14, %s1781_s27 }
  0x5e   : > { %p1377_p13 = por %p1376_p10, %p1375_p5 }
  0x5f   : > { %p1373_p3 = pneg %p1372_p11 }
  0x60   : > { %p1379_p12 = por %p1378_p6, %p1377_p13 }
  0x62   : > { %p1380_p8 = pnand %p1379_p12, %p1373_p3 }
  0x64   : > { %1383 = shalt.err (!%p1380_p8)
}
  0x65   : > { %s1384_s1 = scalar_lea.vmem %s366_s10, 512  ;;  %s1579_s22 = smov [#allocation9]  }
  0x66   : > { %p1385_p9 = scmp.ne.s32.totalorder %s366_s10, %s1384_s1  ;;  %s1389_s25 = sshll.u32 %s1579_s22, 4  ;;  %s1390_s25 = int_to_ptr.vmem [resolvable:$false] %s1389_s25 }
  0x67   : > { %s1391_s12 = scalar_lea.vmem %s1390_s25, 1024  ;;  %p1392_p1 = scmp.lt.s32.totalorder %s366_s10, %s1390_s25 }
  0x68   : > { %p1387_p2 = pnand %p1385_p9, %p1736_p4  ;;  %p1393_p11 = scmp.lt.s32.totalorder %s1391_s12, %s1384_s1 }
  0x6a   : > { %p1388_p7 = pneg %p1387_p2  ;;  %p1394_p0 = por %p1393_p11, %p1392_p1 }
  0x6c   : > { %p1395_p5 = pnand %p1394_p0, %p1388_p7 }
  0x6e   : > { %1398 = shalt.err (!%p1395_p5)
}
  0x6f   : > { %p2111_p10 = scmp.ne.s32.totalorder %s2105_s24, 0  ;;  %s1068_s6 = sshll.u32 %s1571_s9, 13 }
  0x70   : > { %s1829_s20 = scalar_lea.hbm %s2071_s4, %s1068_s6  ;;  %s376_s16 = scalar_lea.vmem [#allocation10], %s1044_s18 }
  0x71   : > { %1231 = dma.hbm_to_vmem [thread:$0]  (!%p2111_p10), %s1781_s27, 512, %s366_s10, %s1730_s15  }
  0x72   : > { %s383_s23 = sshll.u32 %s376_s16, 4  ;;  %s373_s26 = scalar_lea.sflag [#allocation11], %s1704_s21  ;;  %s1833_s23 = int_to_ptr.vmem [resolvable:$true] %s383_s23 }
  0x73   : > { %s1399_s13 = scalar_lea.hbm %s1829_s20, 8192  ;;  %s1404_s10 = scalar_lea.hbm %s2071_s4, 16384 }
  0x74   : > { %p1400_p0 = scmp.ne.s32.totalorder %s1829_s20, %s1399_s13  ;;  %p1405_p6 = scmp.lt.u32.totalorder %s1829_s20, %s2071_s4 }
  0x75   : > { %p1406_p12 = scmp.lt.u32.totalorder %s1404_s10, %s1399_s13  ;;  %p1408_p9 = scmp.lt.u32.totalorder %s1399_s13, %s1829_s20 }
  0x76   : > { %p1402_p3 = pnand %p1400_p0, %p1736_p4 }
  0x77   : > { %p1407_p8 = por %p1406_p12, %p1405_p6 }
  0x78   : > { %p1403_p13 = pneg %p1402_p3 }
  0x79   : > { %p1409_p2 = por %p1408_p9, %p1407_p8 }
  0x7b   : > { %p1410_p7 = pnand %p1409_p2, %p1403_p13 }
  0x7d   : > { %1413 = shalt.err (!%p1410_p7)
}
  0x7e   : > { %s1414_s18 = scalar_lea.vmem %s1833_s23, 8192  ;;  %s1580_s25 = smov [#allocation10]  }
  0x7f   : > { %p1415_p1 = scmp.ne.s32.totalorder %s1833_s23, %s1414_s18  ;;  %s1419_s12 = sshll.u32 %s1580_s25, 4  ;;  %s1420_s12 = int_to_ptr.vmem [resolvable:$false] %s1419_s12 }
  0x80   : > { %s1421_s6 = scalar_lea.vmem %s1420_s12, 16384  ;;  %p1422_p0 = scmp.lt.s32.totalorder %s1833_s23, %s1420_s12 }
  0x81   : > { %p1417_p11 = pnand %p1415_p1, %p1736_p4  ;;  %p1423_p3 = scmp.lt.s32.totalorder %s1421_s6, %s1414_s18 }
  0x83   : > { %p1418_p5 = pneg %p1417_p11  ;;  %p1424_p6 = por %p1423_p3, %p1422_p0 }
  0x85   : > { %p1425_p12 = pnand %p1424_p6, %p1418_p5 }
  0x87   : > { %1428 = shalt.err (!%p1425_p12)
}
  0x88   : > { %s1581_s8 = smov 128   ;;  %s1582_s14 = smov 8  }
  0x89   : > { %1234 = dma.hbm_to_vmem [thread:$0]  (!%p2111_p10), %s1829_s20, 8192, %s1833_s23, %s373_s26, %s1581_s8, %s1581_s8, %s1582_s14  }
  0x8a   : > { %p2112_p4 = scmp.ne.s32.totalorder %s2110_s19, 0 }
  0x8b   : > { %s1862_s29 = sand.u32 (!%p2112_p4), 1, %s1559_s28   ;;  %p2113_p13 = scmp.ne.s32.totalorder (!%p2112_p4), %s2099_s17, 0 }
  0x8c   : > { %395 = sbr.rel (%p2112_p4) target bundleno = 672 (0x2a0), region = 44  ;;  %s1048_s16 = sshll.u32 (!%p2112_p4), %s1862_s29, 5 }
  0x8d   : > { %s398_s13 = scalar_lea.sflag (!%p2112_p4), [#allocation5], %s1862_s29  ;;  %s1866_s15 = scalar_lea.vmem (!%p2112_p4), [#allocation4], %s1048_s16 }
  0x93   : > { %1534 = dma.done.wait (%p2113_p13), %s398_s13, 512  }
  0x94   : > { %1536 = vsyncadd (%p2113_p13), %s398_s13, 4294966784  ;;  %s406_s21 = sand.u32 1, %s1664_s11   ;;  %s1873_s19 = scalar_lea.vmem [#allocation7], %s1048_s16 }
  0x95   : > { %s407_s24 = scalar_lea.sflag [#allocation8], %s406_s21 }
  0x96   : > { %1538 = dma.done.wait (%p2113_p13), %s407_s24, 1024  }
  0x97   : > { %1540 = vsyncadd (%p2113_p13), %s407_s24, 4294966272  ;;  %s1051_s20 = sshll.u32 %s1862_s29, 9  ;;  %s1880_s23 = scalar_lea.vmem [#allocation9], %s1048_s16 }
  0x98   : > { %s425_s26 = scalar_lea.sflag [#allocation11], %s1862_s29  ;;  %s1883_s27 = scalar_lea.vmem [#allocation10], %s1051_s20 }
  0x99   : > { %1542 = dma.done.wait (%p2113_p13), %s425_s26, 8192  }
  0x9a   : > { %1544 = vsyncadd (%p2113_p13), %s425_s26, 4294959104  ;;  %s1889_s10 = scalar_lea.vmem [#allocation12], %s1048_s16  ;;  %p1053_p10 = scmp.ne.s32.totalorder %s1567_s30, 0 }
  0x9b   : > { %vm494_vm0 = vcmask (!%p1053_p10), 7168   ;;  %v1583_v0 = vmov (!%p1053_p10), 0.0  }
  0x9c   : > { %492 = sbr.rel (%p1053_p10) target bundleno = 163 (0xa3), region = 64  ;;  %493 = vst [vmem:[#allocation2] sm:$0xff] (!%p1053_p10), %v1583_v0  ;;  %495 = vst.msk [vmem:[#allocation3] sm:$0xff] (!%p1053_p10), %vm494_vm0, %v1583_v0 }
  0xa3 PF: > { %v541_v1 = vld [vmem:[%s1883_s27 + $0x80] sm:$0xff]  ;;  %v542_v2 = vld [vmem:[%s1883_s27 + $0x88] sm:$0xff]  ;;  %v543_v12 = vld [vmem:[%s1883_s27 + $0x90] sm:$0xff]  ;;  %vm750_vm1 = vcmask 7168   ;;  %p1054_p8 = scmp.ne.s32.totalorder %s1567_s30, 1 }
  0xa4   : > { %v573_v3 = vld [vmem:[%s1883_s27 + $0x180] sm:$0xff]  ;;  %v1140_v4 = vpack.c.bf16 %v542_v2, %v541_v1  ;;  %v574_v5 = vld [vmem:[%s1883_s27 + $0x188] sm:$0xff]  ;;  %v544_v14 = vld [vmem:[%s1883_s27 + $0x98] sm:$0xff] }
  0xa5   : > { %v525_v6 = vld [vmem:[%s1883_s27] sm:$0xff]  ;;  %v526_v7 = vld [vmem:[%s1883_s27 + $0x8] sm:$0xff]  ;;  %v1172_v8 = vpack.c.bf16 %v574_v5, %v573_v3  ;;  %v575_v15 = vld [vmem:[%s1883_s27 + $0x190] sm:$0xff]  ;;  %v1144_v17 = vpack.c.bf16 %v544_v14, %v543_v12 }
  0xa6   : > { %v1142_v9 = vpack.c.bf16 %v526_v7, %v525_v6  ;;  %v557_v10 = vld [vmem:[%s1883_s27 + $0x100] sm:$0xff]  ;;  %v558_v11 = vld [vmem:[%s1883_s27 + $0x108] sm:$0xff]  ;;  %1141 = vmatprep.subr.bf16.mxu0 %v1140_v4  ;;  %v576_v16 = vld [vmem:[%s1883_s27 + $0x198] sm:$0xff] }
  0xa7   : > { %v1174_v13 = vpack.c.bf16 %v558_v11, %v557_v10  ;;  %1173 = vmatprep.subr.bf16.mxu1 %v1172_v8  ;;  %v1176_v18 = vpack.c.bf16 %v576_v16, %v575_v15  ;;  %v527_v19 = vld [vmem:[%s1883_s27 + $0x10] sm:$0xff]  ;;  %v528_v20 = vld [vmem:[%s1883_s27 + $0x18] sm:$0xff]  ;;  %v545_v24 = vld [vmem:[%s1883_s27 + $0xa0] sm:$0xff] }
  0xa8   : > { %1143 = vmatpush3.bf16.msra.mxu0 %v1142_v9  ;;  %v559_v21 = vld [vmem:[%s1883_s27 + $0x110] sm:$0xff]  ;;  %v1146_v22 = vpack.c.bf16 %v528_v20, %v527_v19  ;;  %v560_v23 = vld [vmem:[%s1883_s27 + $0x118] sm:$0xff]  ;;  %v546_v25 = vld [vmem:[%s1883_s27 + $0xa8] sm:$0xff] }
  0xa9   : > { %1175 = vmatpush3.bf16.msra.mxu1 %v1174_v13  ;;  %1145 = vmatprep.subr.bf16.mxu0 %v1144_v17  ;;  %v1178_v26 = vpack.c.bf16 %v560_v23, %v559_v21  ;;  %v1148_v27 = vpack.c.bf16 %v546_v25, %v545_v24  ;;  %v577_v28 = vld [vmem:[%s1883_s27 + $0x1a0] sm:$0xff]  ;;  %v578_v29 = vld [vmem:[%s1883_s27 + $0x1a8] sm:$0xff]  ;;  %v547_v36 = vld [vmem:[%s1883_s27 + $0xb0] sm:$0xff] }
  0xaa   : > { %1177 = vmatprep.subr.bf16.mxu1 %v1176_v18  ;;  %v529_v30 = vld [vmem:[%s1883_s27 + $0x20] sm:$0xff]  ;;  %v1180_v31 = vpack.c.bf16 %v578_v29, %v577_v28  ;;  %v530_v32 = vld [vmem:[%s1883_s27 + $0x28] sm:$0xff]  ;;  %v548_v37 = vld [vmem:[%s1883_s27 + $0xb8] sm:$0xff] }
  0xab   : > { %v561_v33 = vld [vmem:[%s1883_s27 + $0x120] sm:$0xff]  ;;  %v562_v34 = vld [vmem:[%s1883_s27 + $0x128] sm:$0xff]  ;;  %v1150_v35 = vpack.c.bf16 %v530_v32, %v529_v30  ;;  %v579_v38 = vld [vmem:[%s1883_s27 + $0x1b0] sm:$0xff]  ;;  %v1152_v40 = vpack.c.bf16 %v548_v37, %v547_v36 }
  0xac   : > { %1147 = vmatpush3.bf16.msra.mxu0 %v1146_v22  ;;  %v1182_v39 = vpack.c.bf16 %v562_v34, %v561_v33  ;;  %v580_v41 = vld [vmem:[%s1883_s27 + $0x1b8] sm:$0xff]  ;;  %v531_v42 = vld [vmem:[%s1883_s27 + $0x30] sm:$0xff]  ;;  %v549_v47 = vld [vmem:[%s1883_s27 + $0xc0] sm:$0xff] }
  0xad   : > { %1179 = vmatpush3.bf16.msra.mxu1 %v1178_v26  ;;  %1149 = vmatprep.subr.bf16.mxu0 %v1148_v27  ;;  %v532_v43 = vld [vmem:[%s1883_s27 + $0x38] sm:$0xff]  ;;  %v1184_v44 = vpack.c.bf16 %v580_v41, %v579_v38  ;;  %v563_v45 = vld [vmem:[%s1883_s27 + $0x130] sm:$0xff]  ;;  %v550_v48 = vld [vmem:[%s1883_s27 + $0xc8] sm:$0xff] }
  0xae   : > { %1181 = vmatprep.subr.bf16.mxu1 %v1180_v31  ;;  %v564_v46 = vld [vmem:[%s1883_s27 + $0x138] sm:$0xff]  ;;  %v581_v49 = vld [vmem:[%s1883_s27 + $0x1c0] sm:$0xff]  ;;  %v582_v50 = vld [vmem:[%s1883_s27 + $0x1c8] sm:$0xff]  ;;  %v1154_v51 = vpack.c.bf16 %v532_v43, %v531_v42  ;;  %v1156_v53 = vpack.c.bf16 %v550_v48, %v549_v47 }
  0xaf   : > { %v1186_v52 = vpack.c.bf16 %v564_v46, %v563_v45  ;;  %v533_v54 = vld [vmem:[%s1883_s27 + $0x40] sm:$0xff]  ;;  %v534_v55 = vld [vmem:[%s1883_s27 + $0x48] sm:$0xff]  ;;  %v1188_v57 = vpack.c.bf16 %v582_v50, %v581_v49  ;;  %v551_v59 = vld [vmem:[%s1883_s27 + $0xd0] sm:$0xff] }
  0xb0   : > { %1151 = vmatpush3.bf16.msra.mxu0 %v1150_v35  ;;  %v565_v56 = vld [vmem:[%s1883_s27 + $0x140] sm:$0xff]  ;;  %v566_v58 = vld [vmem:[%s1883_s27 + $0x148] sm:$0xff]  ;;  %v552_v60 = vld [vmem:[%s1883_s27 + $0xd8] sm:$0xff]  ;;  %v1158_v63 = vpack.c.bf16 %v534_v55, %v533_v54 }
  0xb1   : > { %1183 = vmatpush3.bf16.msra.mxu1 %v1182_v39  ;;  %1153 = vmatprep.subr.bf16.mxu0 %v1152_v40  ;;  %v583_v61 = vld [vmem:[%s1883_s27 + $0x1d0] sm:$0xff]  ;;  %v584_v62 = vld [vmem:[%s1883_s27 + $0x1d8] sm:$0xff]  ;;  %v1190_v1 = vpack.c.bf16 %v566_v58, %v565_v56  ;;  %v1160_v2 = vpack.c.bf16 %v552_v60, %v551_v59  ;;  %v553_v7 = vld [vmem:[%s1883_s27 + $0xe0] sm:$0xff] }
  0xb2   : > { %1185 = vmatprep.subr.bf16.mxu1 %v1184_v44  ;;  %v535_v0 = vld [vmem:[%s1883_s27 + $0x50] sm:$0xff]  ;;  %v536_v3 = vld [vmem:[%s1883_s27 + $0x58] sm:$0xff]  ;;  %v1192_v6 = vpack.c.bf16 %v584_v62, %v583_v61  ;;  %v554_v8 = vld [vmem:[%s1883_s27 + $0xe8] sm:$0xff] }
  0xb3   : > { %v567_v4 = vld [vmem:[%s1883_s27 + $0x150] sm:$0xff]  ;;  %v568_v5 = vld [vmem:[%s1883_s27 + $0x158] sm:$0xff]  ;;  %v585_v9 = vld [vmem:[%s1883_s27 + $0x1e0] sm:$0xff]  ;;  %v1162_v13 = vpack.c.bf16 %v536_v3, %v535_v0  ;;  %v1164_v19 = vpack.c.bf16 %v554_v8, %v553_v7 }
  0xb4   : > { %1155 = vmatpush3.bf16.msra.mxu0 %v1154_v51  ;;  %v586_v10 = vld [vmem:[%s1883_s27 + $0x1e8] sm:$0xff]  ;;  %v537_v11 = vld [vmem:[%s1883_s27 + $0x60] sm:$0xff]  ;;  %v555_v16 = vld [vmem:[%s1883_s27 + $0xf0] sm:$0xff]  ;;  %v1194_v18 = vpack.c.bf16 %v568_v5, %v567_v4 }
  0xb5   : > { %1187 = vmatpush3.bf16.msra.mxu1 %v1186_v52  ;;  %1157 = vmatprep.subr.bf16.mxu0 %v1156_v53  ;;  %v538_v12 = vld [vmem:[%s1883_s27 + $0x68] sm:$0xff]  ;;  %v569_v14 = vld [vmem:[%s1883_s27 + $0x160] sm:$0xff]  ;;  %v556_v17 = vld [vmem:[%s1883_s27 + $0xf8] sm:$0xff]  ;;  %v1196_v24 = vpack.c.bf16 %v586_v10, %v585_v9 }
  0xb6   : > { %1189 = vmatprep.subr.bf16.mxu1 %v1188_v57  ;;  %v570_v15 = vld [vmem:[%s1883_s27 + $0x168] sm:$0xff]  ;;  %v587_v20 = vld [vmem:[%s1883_s27 + $0x1f0] sm:$0xff]  ;;  %v588_v21 = vld [vmem:[%s1883_s27 + $0x1f8] sm:$0xff]  ;;  %v1166_v33 = vpack.c.bf16 %v538_v12, %v537_v11  ;;  %v1168_v37 = vpack.c.bf16 %v556_v17, %v555_v16 }
  0xb7   : > { %v497_v22 = vld [vmem:[%s1880_s23 + $0x8] sm:$0xff]  ;;  %v499_v26 = vld [vmem:[%s1880_s23 + $0x18] sm:$0xff]  ;;  %v496_v28 = vld [vmem:[%s1880_s23] sm:$0xff]  ;;  %v1198_v36 = vpack.c.bf16 %v570_v15, %v569_v14  ;;  %v1200_v40 = vpack.c.bf16 %v588_v21, %v587_v20 }
  0xb8   : > { %1159 = vmatpush3.bf16.msra.mxu0 %v1158_v63  ;;  %v501_v23 = vld [vmem:[%s1866_s15 + $0x8] sm:$0xff]  ;;  %v503_v27 = vld [vmem:[%s1866_s15 + $0x18] sm:$0xff]  ;;  %v500_v30 = vld [vmem:[%s1866_s15] sm:$0xff] }
  0xb9   : > { %1191 = vmatpush3.bf16.msra.mxu1 %v1190_v1  ;;  %1161 = vmatprep.subr.bf16.mxu0 %v1160_v2  ;;  %v505_v25 = vadd.f32 %v501_v23, %v497_v22  ;;  %v507_v29 = vadd.f32 %v503_v27, %v499_v26  ;;  %v498_v31 = vld [vmem:[%s1880_s23 + $0x10] sm:$0xff]  ;;  %v504_v34 = vadd.f32 %v500_v30, %v496_v28  ;;  %v540_v39 = vld [vmem:[%s1883_s27 + $0x78] sm:$0xff]  ;;  %v732_v50 = vld [vmem:[%s1873_s19 + $0x8] sm:$0xff]  ;;  %v1584_v26 = vmov (!%p1054_p8), 0  }
  0xba   : > { %1193 = vmatprep.subr.bf16.mxu1 %v1192_v6  ;;  %v502_v32 = vld [vmem:[%s1866_s15 + $0x10] sm:$0xff]  ;;  %v572_v42 = vld [vmem:[%s1883_s27 + $0x178] sm:$0xff]  ;;  %v731_v56 = vld [vmem:[%s1873_s19] sm:$0xff]  ;;  %1307 = vset.pattern.permute.xlu1 (!%p1054_p8), %v1584_v26 }
  0xbb   : > { %1299 = vtanh.f32 %v505_v25  ;;  %v506_v35 = vadd.f32 %v502_v32, %v498_v31  ;;  %v539_v38 = vld [vmem:[%s1883_s27 + $0x70] sm:$0xff]  ;;  %v734_v57 = vld [vmem:[%s1873_s19 + $0x18] sm:$0xff]  ;;  %1308 = vset.pattern.permute.xlu0 (!%p1054_p8), %v1584_v26  ;;  %v779_v31 = vlaneseq (!%p1054_p8) }
  0xbc   : > { %1163 = vmatpush3.bf16.msra.mxu0 %v1162_v13  ;;  %1301 = vtanh.f32 %v507_v29  ;;  %v571_v41 = vld [vmem:[%s1883_s27 + $0x170] sm:$0xff]  ;;  %v1170_v43 = vpack.c.bf16 %v540_v39, %v539_v38  ;;  %v739_v8 = vld [vmem:[#allocation3] sm:$0xff] }
  0xbd   : > { %1195 = vmatpush3.bf16.msra.mxu1 %v1194_v18  ;;  %1165 = vmatprep.subr.bf16.mxu0 %v1164_v19  ;;  %1303 = vtanh.f32 %v504_v34  ;;  %v1202_v44 = vpack.c.bf16 %v572_v42, %v571_v41  ;;  %v733_v59 = vld [vmem:[%s1873_s19 + $0x10] sm:$0xff] }
  0xbe   : > { %1197 = vmatprep.subr.bf16.mxu1 %v1196_v24  ;;  %1305 = vtanh.f32 %v506_v35  ;;  %v524_v17 = vld [vmem:[#allocation2] sm:$0xff] }
  0xbf   : > { %v1055_v21 = vld [vmem:[%s2072_s5] ss:$0 sm:$0xff] (!%p1054_p8) }
  0xc0   : > { %1167 = vmatpush3.bf16.msra.mxu0 %v1166_v33  ;;  %v766_v22 = vld [vmem:[%s2070_s3] sm:$0xff] (!%p1054_p8)  ;;  %v780_v33 = vand.u32 (!%p1054_p8), 127, %v779_v31 }
  0xc1   : > { %1199 = vmatpush3.bf16.msra.mxu1 %v1198_v36  ;;  %1169 = vmatprep.subr.bf16.mxu0 %v1168_v37  ;;  %v770_v24 = vsub.f32 (!%p1054_p8), 1.0, %v766_v22  ;;  %v772_v25 = vmul.f32 (!%p1054_p8), 10000.0, %v766_v22 }
  0xc2   : > { %1201 = vmatprep.subr.bf16.mxu1 %v1200_v40  ;;  %vm782_vm2 = vcmp.eq.s32.totalorder (!%p1054_p8), %v780_v33, 1  ;;  %vm781_vm3 = vcmp.eq.s32.totalorder (!%p1054_p8), %v780_v33, 0 }
  0xc4   : > { %1171 = vmatpush3.bf16.msra.mxu0 %v1170_v43 }
  0xc5   : > { %1203 = vmatpush3.bf16.msra.mxu1 %v1202_v44  ;;  %v1300_v45 = vpop.eup %1299 }
  0xc6   : > { %v1302_v46 = vpop.eup %1301  ;;  %v513_v47 = vadd.f32 1.0, %v1300_v45 }
  0xc7   : > { %v1304_v48 = vpop.eup %1303  ;;  %v515_v49 = vadd.f32 1.0, %v1302_v46 }
  0xc8   : > { %v1306_v51 = vpop.eup %1305  ;;  %v517_v52 = vmul.f32 0.5, %v513_v47  ;;  %v512_v53 = vadd.f32 1.0, %v1304_v48 }
  0xc9   : > { %v519_v54 = vmul.f32 0.5, %v515_v49  ;;  %v514_v55 = vadd.f32 1.0, %v1306_v51 }
  0xca   : > { %521 = vst [vmem:[%s1889_s10 + $0x8] sm:$0xff] %v517_v52  ;;  %653 = vmatprep.mubr.f32.mxu0 %v517_v52  ;;  %v516_v58 = vmul.f32 0.5, %v512_v53  ;;  %v736_v60 = vsub.f32 %v517_v52, %v732_v50 }
  0xcb   : > { %523 = vst [vmem:[%s1889_s10 + $0x18] sm:$0xff] %v519_v54  ;;  %723 = vmatprep.mubr.f32.mxu1 %v519_v54  ;;  %v518_v61 = vmul.f32 0.5, %v514_v55  ;;  %v738_v63 = vsub.f32 %v519_v54, %v734_v57 }
  0xcc   : > { %520 = vst [vmem:[%s1889_s10] sm:$0xff] %v516_v58  ;;  %654 = vmatmul.mubr.f32.vlgmr.msra.gmra.mrb[0].mxu0 %v516_v58  ;;  %v735_v62 = vsub.f32 %v516_v58, %v731_v56  ;;  %v741_v0 = vmul.f32 %v736_v60, %v736_v60 }
  0xcd   : > { %522 = vst [vmem:[%s1889_s10 + $0x10] sm:$0xff] %v518_v61  ;;  %724 = vmatmul.mubr.f32.vlgmr.msra.gmra.mrb[0].mxu1 %v518_v61  ;;  %v737_v1 = vsub.f32 %v518_v61, %v733_v59  ;;  %v743_v4 = vmul.f32 %v738_v63, %v738_v63 }
  0xce   : > { %v740_v2 = vmul.f32 %v735_v62, %v735_v62 }
  0xcf   : > { %v742_v3 = vmul.f32 %v737_v1, %v737_v1 }
  0xd0   : > { %v744_v5 = vadd.f32 %v741_v0, %v740_v2 }
  0xd2   : > { %v745_v6 = vadd.f32 %v744_v5, %v742_v3 }
  0xd4   : > { %v746_v7 = vadd.f32 %v745_v6, %v743_v4 }
  0xd6   : > { %747 = vadd.xlane.f32.xlu0 %v746_v7 }
 0x163   : > { %v748_v9 = vpop.xlane.xlu0 %747 }
 0x164   : > { %v749_v10 = vadd.f32 %v748_v9, %v739_v8 }
 0x166   : > { %751 = vst.msk [vmem:[#allocation3] sm:$0xff] %vm750_vm1, %v749_v10 }
 0x16d   : > { %v778_v27 = vld [vmem:[#allocation3] sm:$0xff] (!%p1054_p8) }
 0x16e   : > { %786 = vperm.xlu1 (!%p1054_p8), %1307, %v778_v27  }
 0x19f   : > { %v1102_v11 = vpop.f32.mrb[0].mxu0 }
 0x1a0   : > { %v1137_v12 = vpop.f32.mrb[0].mxu1  ;;  %v1103_v13 = vpop.f32.mrb[1].mxu0 }
 0x1a1   : > { %v1104_v14 = vadd.f32 %v1103_v13, %v1102_v11  ;;  %v1138_v15 = vpop.f32.mrb[1].mxu1 }
 0x1a2   : > { %v1139_v16 = vadd.f32 %v1138_v15, %v1137_v12  ;;  %755 = sbr.rel (%p1054_p8) target bundleno = 589 (0x24d), region = 68 }
 0x1a4   : > { %v726_v18 = vadd.f32 %v1139_v16, %v1104_v14 }
 0x1a6   : > { %v729_v19 = vadd.f32 %v726_v18, %v524_v17 }
 0x1a8   : > { %730 = vst [vmem:[#allocation2] sm:$0xff] %v729_v19 }
 0x1af   : > { %v756_v20 = vld [vmem:[#allocation2] sm:$0xff] }
 0x1b0   : > { %v764_v23 = vadd.f32 %v1055_v21, %v756_v20 }
 0x1b2   : > { %v767_v28 = vmul.f32 %v766_v22, %v764_v23  ;;  %765 = vst [vmem:[#allocation13] sm:$0xff] %v764_v23  ;;  %v771_v29 = vmul.f32 %v770_v24, %v764_v23 }
 0x1b4   : > { %768 = vadd.xlane.f32.xlu0 %v767_v28  ;;  %v773_v30 = vsub.f32 %v771_v29, %v772_v25 }
 0x1b8   : > { %774 = vmax.xlane.f32.xlu0 %v773_v30 }
 0x1ed   : > { %v787_v37 = vpop.permute.xlu1 %786 }
 0x241   : > { %v769_v32 = vpop.xlane.xlu0 %768 }
 0x245   : > { %v775_v34 = vpop.xlane.xlu0 %774 }
 0x246   : > { %v776_v35 = vsub.f32 %v769_v32, %v775_v34 }
 0x248   : > { %v777_v36 = vmax.f32 %v776_v35, 0.0 }
 0x24a   : > { %v783_v38 = vsel %vm782_vm2, %v777_v36, 0.0 }
 0x24b   : > { %v789_v39 = vsel %vm781_vm3, %v787_v37, %v783_v38 }
 0x24c   : > { %790 = vst [vmem:[#allocation15] sm:$0xff] %v789_v39 }
 0x24d PF: > { %s1585_s25 = smov [#allocation13]   ;;  %s1069_s6 = sshll.u32 %s1567_s30, 9 }
 0x24e   : > { %s821_s12 = sshll.u32 %s1585_s25, 4  ;;  %p2114_p2 = scmp.eq.s32.totalorder %s1664_s11, 1  ;;  %s822_s12 = int_to_ptr.vmem [resolvable:$true] %s821_s12 }
 0x24f   : > { %s1429_s8 = scalar_lea.vmem %s822_s12, 128  ;;  %p1436_p11 = scmp.lt.s32.totalorder %s822_s12, %s822_s12 }
 0x250   : > { %p1430_p9 = scmp.ne.s32.totalorder %s822_s12, %s1429_s8  ;;  %p1437_p5 = scmp.lt.s32.totalorder %s1429_s8, %s1429_s8 }
 0x252   : > { %p1431_p7 = pnand %p1430_p9, %p2114_p2  ;;  %p1438_p0 = por %p1437_p5, %p1436_p11 }
 0x254   : > { %p1432_p1 = pneg %p1431_p7 }
 0x256   : > { %p1439_p3 = pnand %p1438_p0, %p1432_p1 }
 0x258   : > { %1442 = shalt.err (!%p1439_p3)
}
 0x259   : > { %s1443_s13 = scalar_lea.hbm %s2074_s7, 128  ;;  %p2115_p12 = pmov %p2114_p2 }
 0x25a   : > { %p1444_p6 = scmp.ne.s32.totalorder %s2074_s7, %s1443_s13  ;;  %p1449_p10 = scmp.lt.u32.totalorder %s1443_s13, %s2074_s7 }
 0x25c   : > { %p1445_p4 = pnand %p1444_p6, %p2115_p12 }
 0x25e   : > { %p1446_p13 = pneg %p1445_p4 }
 0x260   : > { %p1451_p8 = pnand %p1449_p10, %p1446_p13 }
 0x262   : > { %1454 = shalt.err (!%p1451_p8)
}
 0x263   : > { %p2116_p9 = pmov %p2114_p2  ;;  %s2117_s23 = sld [smem:[#allocation25_spill]] }
 0x264   : > { %s2118_s17 = sld [smem:[#allocation29_spill]]  ;;  %s808_s22 = sshll.u32 %s1889_s10, 4  ;;  %s809_s22 = int_to_ptr.vmem [resolvable:$true] %s808_s22 }
 0x265   : > { %1214 = dma.vmem_to_hbm [thread:$0]  (%p2116_p9), %s822_s12, 128, %s2074_s7, [#allocation14]  }
 0x266   : > { %s792_s18 = scalar_lea.sflag [#allocation6], %s1862_s29  ;;  %s1455_s25 = scalar_lea.vmem %s809_s22, 512 }
 0x267   : > { %p1456_p2 = scmp.ne.s32.totalorder %s809_s22, %s1455_s25  ;;  %s1586_s8 = smov [#allocation12]  }
 0x268   : > { %s1459_s14 = sshll.u32 %s1586_s8, 4  ;;  %s1460_s14 = int_to_ptr.vmem [resolvable:$false] %s1459_s14 }
 0x269   : > { %p2119_p7 = scmp.ne.s32.totalorder %s2117_s23, 0  ;;  %s1461_s16 = scalar_lea.vmem %s1460_s14, 1024 }
 0x26a   : > { %s2001_s1 = scalar_lea.hbm %s2118_s17, %s1069_s6  ;;  %p1462_p5 = scmp.lt.s32.totalorder %s809_s22, %s1460_s14 }
 0x26b   : > { %p1457_p1 = pnand %p1456_p2, %p2119_p7  ;;  %p1463_p0 = scmp.lt.s32.totalorder %s1461_s16, %s1455_s25 }
 0x26d   : > { %p1458_p11 = pneg %p1457_p1  ;;  %p1464_p3 = por %p1463_p0, %p1462_p5 }
 0x26f   : > { %p1465_p6 = pnand %p1464_p3, %p1458_p11 }
 0x271   : > { %1468 = shalt.err (!%p1465_p6)
}
 0x272   : > { %s1469_s29 = scalar_lea.hbm %s2001_s1, 512  ;;  %s1473_s6 = scalar_lea.hbm %s2118_s17, 1024 }
 0x273   : > { %p1470_p12 = scmp.ne.s32.totalorder %s2001_s1, %s1469_s29  ;;  %p1474_p10 = scmp.lt.u32.totalorder %s2001_s1, %s2118_s17 }
 0x274   : > { %p1475_p8 = scmp.lt.u32.totalorder %s1473_s6, %s1469_s29  ;;  %p1477_p2 = scmp.lt.u32.totalorder %s1469_s29, %s2001_s1 }
 0x275   : > { %p1471_p4 = pnand %p1470_p12, %p2119_p7 }
 0x276   : > { %p1476_p9 = por %p1475_p8, %p1474_p10 }
 0x277   : > { %p1472_p13 = pneg %p1471_p4 }
 0x278   : > { %p1478_p1 = por %p1477_p2, %p1476_p9 }
 0x27a   : > { %p1479_p11 = pnand %p1478_p1, %p1472_p13 }
 0x27c   : > { %1482 = shalt.err (!%p1479_p11)
}
 0x27d   : > { %1212 = dma.vmem_to_hbm [thread:$0]  (%p2119_p7), %s809_s22, 512, %s2001_s1, %s792_s18  }
 0x27e   : > { %s1587_s21 = smov [#allocation15]   ;;  %p2120_p0 = scmp.eq.s32.totalorder %s1664_s11, 1 }
 0x27f   : > { %s834_s30 = sshll.u32 %s1587_s21, 4  ;;  %s835_s30 = int_to_ptr.vmem [resolvable:$true] %s834_s30 }
 0x280   : > { %s1483_s24 = scalar_lea.vmem %s835_s30, 128  ;;  %p1490_p12 = scmp.lt.s32.totalorder %s835_s30, %s835_s30 }
 0x281   : > { %p1484_p5 = scmp.ne.s32.totalorder %s835_s30, %s1483_s24  ;;  %p1491_p4 = scmp.lt.s32.totalorder %s1483_s24, %s1483_s24 }
 0x283   : > { %p1485_p3 = pnand %p1484_p5, %p2120_p0  ;;  %p1492_p10 = por %p1491_p4, %p1490_p12 }
 0x285   : > { %p1486_p6 = pneg %p1485_p3 }
 0x287   : > { %p1493_p8 = pnand %p1492_p10, %p1486_p6 }
 0x289   : > { %1496 = shalt.err (!%p1493_p8)
}
 0x28a   : > { %s2121_s26 = sld [smem:[#allocation30_spill]]  ;;  %p2122_p13 = pmov %p2120_p0 }
 0x290   : > { %s1497_s23 = scalar_lea.hbm %s2121_s26, 128 }
 0x291   : > { %p1498_p7 = scmp.ne.s32.totalorder %s2121_s26, %s1497_s23  ;;  %p1503_p1 = scmp.lt.u32.totalorder %s1497_s23, %s2121_s26 }
 0x293   : > { %p1499_p9 = pnand %p1498_p7, %p2122_p13 }
 0x295   : > { %p1500_p2 = pneg %p1499_p9 }
 0x297   : > { %p1505_p11 = pnand %p1503_p1, %p1500_p2 }
 0x299   : > { %1508 = shalt.err (!%p1505_p11)
}
 0x29a   : > { %p2123_p5 = pmov %p2120_p0 }
 0x29c   : > { %1216 = dma.vmem_to_hbm [thread:$0]  (%p2123_p5), %s835_s30, 128, %s2121_s26, [#allocation14]  }
 0x29d   : > { %1546 = dma.done.wait (%p2120_p0), [#allocation14], 256   ;;  %p2124_p3 = pmov %p2120_p0 }
 0x29f   : > { %1548 = vsyncadd (%p2124_p3), [#allocation14], 4294967040 }
 0x2a0 PF: > { %s2125_s14 = sld [smem:[#allocation21_spill]]  ;;  %s2126_s16 = sld [smem:[#allocation27_spill]] }
 0x2a1   : > { %s2127_s29 = sld [smem:[#allocation23_spill]] }
 0x2a6   : > { %s854_s10 = sand.u32 1, %s2125_s14   ;;  %p2128_p6 = scmp.ne.s32.totalorder %s2126_s16, 0 }
 0x2a7   : > { %p2129_p12 = scmp.ge.s32.totalorder %s2127_s29, 2  ;;  %s855_s12 = scalar_lea.sflag [#allocation6], %s854_s10 }
 0x2a9   : > { %p1236_p4 = pnand %p2129_p12, %p2128_p6 }
 0x2ab   : > { %1550 = dma.done.wait (!%p1236_p4), %s855_s12, 512  }
 0x2ac   : > { %1552 = vsyncadd (!%p1236_p4), %s855_s12, 4294966784  ;;  %s32_s10 = sadd.s32 1, %s2127_s29   ;;  %s2130_s6 = sld [smem:[#allocation22_spill]] }
 0x2ad   : > { %p29_p10 = scmp.ge.s32.totalorder %s32_s10, 4   ;;  %s2131_s29 = sld [smem:[#allocation26_spill]] }
 0x2ae   : > { %s2132_s11 = sld [smem:[#allocation24_spill]]  ;;  %s2133_s27 = smov %s1559_s28 }
 0x2af   : > { %s2135_s30 = smov %s1571_s9  ;;  %31 = sbr.rel (!%p29_p10) target bundleno = 15 (0xf), region = 155 }
 0x2b2   : > { %s2134_s28 = smov %s2130_s6 }
 0x2b4   : > { %s2136_s9 = smov %s2132_s11 }
 0x2b6   :  { %860 = vsyncpa [#allocation5], 1 }
 0x2b7   :  { %862 = vsyncpa [#allocation5 + $0x1], 1 }
 0x2b8   :  { %863 = vsyncpa [#allocation8], 1 }
 0x2b9   :  { %865 = vsyncpa [#allocation8 + $0x1], 1 }
 0x2ba   :  { %866 = vsyncpa [#allocation11], 1 }
 0x2bb   :  { %868 = vsyncpa [#allocation11 + $0x1], 1 }
 0x2bc   :  { %869 = vsyncpa [#allocation6], 1 }
 0x2bd   :  { %871 = vsyncpa [#allocation6 + $0x1], 1 }
 0x2be   :  { %872 = vsyncpa [#allocation14], 1 }

</bundles_post_ra>
